<compile_context>
chip_gen: v7x
topology: tpu7x:2x2x1
jax: 0.10.0
libtpu: 0.0.40
codegen_flags: <defaults>
</compile_context>

<pallas_src>
import functools

import jax
import jax.numpy as jnp
from jax.experimental import pallas as pl
from jax.experimental.pallas import tpu as pltpu


def _cdiv(a, b):
    return -(-a // b)


def _burgers_rhs_kernel(u_ref, o_ref, *, mode, c1, c2, cs2, dt, fuse_euler):
    """Streaming stencil: XLU lane rotations + a short FMA-friendly VPU chain."""
    u = u_ref[...].astype(jnp.float32)
    n = u.shape[-1]

    # Periodic neighbours via XLU lane rotation (positive shifts only):
    #   roll(u, n-1) == jnp.roll(u, -1) -> u_{i+1}
    #   roll(u, 1)   == jnp.roll(u, +1) -> u_{i-1}
    u_p = pltpu.roll(u, shift=n - 1, axis=1)
    u_m = pltpu.roll(u, shift=1, axis=1)

    dudx = (u_p - u_m) * c1                      # c1 = 0.5 / dx

    if mode == "advection":
        rhs = -u * dudx
    else:
        lap = (u_p + u_m) - (u + u)              # unscaled second difference
        if mode == "default":
            rhs = c2 * lap - u * dudx            # c2 = nu / dx^2
        elif mode == "smagorinsky":
            # (nu + (Cs*dx)^2*|dudx|) * lap/dx^2 == (nu/dx^2 + Cs^2*|dudx|) * lap
            # TODO(synk): reference `smagorinsky` also receives dt; its exact
            # use in the original code is unknown, RHS form implemented here.
            rhs = (c2 + cs2 * jnp.abs(dudx)) * lap - u * dudx
        else:
            raise ValueError(f"mode {mode} not supported in kernel")

    if fuse_euler:
        rhs = u + dt * rhs                       # optional fused Euler update

    o_ref[...] = rhs.astype(o_ref.dtype)


def _pick_row_tile(bc, n, dtype_bytes=4):
    """Row-tile TM for the (BC, N) slab.

    Goals: (a) 2 arrays x 2 pipeline buffers x tile stays within a
    generation-aware VMEM budget, (b) tiles around ~0.5-1 MiB (already at the
    HBM roofline), (c) the grid has >= 4 steps so double-buffering and v7x's
    two TensorCores have something to overlap.  Pallas handles the ragged
    last block, so no divisibility requirement.
    """
    if bc < 8:
        return bc  # block row dim == full array dim (legal regardless of 8-align)

    try:
        vmem_cap = int(pltpu.get_tpu_info().vmem_capacity_bytes)
    except Exception:
        vmem_cap = 64 << 20  # conservative: v7x physical VMEM per TC

    footprint_budget = min(vmem_cap // 4, 16 << 20)   # 2 arrays x 2 buffers
    row_bytes = n * dtype_bytes

    max_rows = max(8, footprint_budget // (4 * row_bytes))
    target_rows = max(8, (1 << 20) // row_bytes)       # ~1 MiB tiles
    tm = min(max_rows, target_rows)
    tm = max(8, (tm // 8) * 8)

    # Shrink TM until the grid is at least ~4 steps deep.
    while tm > 8 and _cdiv(bc, tm) < 4:
        tm = max(8, ((tm // 2) // 8) * 8)

    # Cheap nudge towards an even step count (v7x: 2 TCs share the grid).
    if tm > 8 and _cdiv(bc, tm) > 1 and _cdiv(bc, tm) % 2 == 1:
        tm2 = max(8, tm - 8)
        if _cdiv(bc, tm2) % 2 == 0:
            tm = tm2
    return tm


class BurgersParamPDE:
    """JAX/Pallas re-implementation of the PyTorch BurgersParamPDE module."""

    def __init__(self, mode, params):
        if mode not in ("default", "advection", "smagorinsky", "none"):
            raise ValueError(f"mode {mode} not supported")
        self.mode = mode
        self.dx = float(params["DX"])
        self.nu = float(params["nu"])
        self.dt = float(params["DT"])
        self.N = int(params["N"])
        self.L = float(params["L"])
        self.Cs = float(params.get("Cs", 0.0))

    def _run(self, state, fuse_euler):
        B, C, N = state.shape
        BC = B * C
        u2d = state.reshape(BC, N)

        tm = _pick_row_tile(BC, N)
        grid = (_cdiv(BC, tm),)

        kernel = functools.partial(
            _burgers_rhs_kernel,
            mode=self.mode,
            c1=0.5 / self.dx,
            c2=self.nu / (self.dx * self.dx),
            cs2=self.Cs * self.Cs,
            dt=self.dt,
            fuse_euler=fuse_euler,
        )
        out2d = pl.pallas_call(
            kernel,
            out_shape=jax.ShapeDtypeStruct((BC, N), state.dtype),
            grid=grid,
            in_specs=[pl.BlockSpec((tm, N), lambda i: (i, 0))],
            out_specs=pl.BlockSpec((tm, N), lambda i: (i, 0)),
            compiler_params=pltpu.CompilerParams(
                dimension_semantics=("parallel",),
                vmem_limit_bytes=32 * 1024 * 1024,
            ),
        )(u2d)
        return out2d.reshape(B, C, N)

    def __call__(self, state):
        """Forward pass: returns the RHS (same semantics as the torch module)."""
        if self.mode == "none":
            # NOTE: the torch module returns scalar 0 here; we return a zeros
            # array shaped like `state` (friendlier for integrators).
            return jnp.zeros_like(state)
        return self._run(state, fuse_euler=False)

    def euler_step(self, state):
        """Optional fused fast path: state + dt * rhs in a single HBM pass."""
        if self.mode == "none":
            return state
        return self._run(state, fuse_euler=True)


def _reference_rhs(state, mode, nu, dx, Cs):
    """Pure-JAX reference for correctness checking."""
    u = state.astype(jnp.float32)
    u_p = jnp.roll(u, -1, axis=-1)
    u_m = jnp.roll(u, +1, axis=-1)
    dudx = (u_p - u_m) / (2.0 * dx)
    d2udx2 = (u_p - 2.0 * u + u_m) / (dx * dx)
    if mode == "default":
        return -u * dudx + nu * d2udx2
    if mode == "advection":
        return -u * dudx
    if mode == "smagorinsky":
        nu_t = (Cs * dx) ** 2 * jnp.abs(dudx)
        return -u * dudx + (nu + nu_t) * d2udx2
    return jnp.zeros_like(u)


if __name__ == "__main__":
    L = 2.0 * jnp.pi
    key = jax.random.PRNGKey(0)
    ok = True

    # 1) Small, deterministic setup (matches module usage): B=2, C=1, N=256.
    B, C, N = 2, 1, 256
    dx = float(L) / N
    params = {"DX": dx, "nu": 0.01, "DT": 1e-3, "N": N, "L": float(L), "Cs": 0.2}
    key, sub = jax.random.split(key)
    state = jax.random.normal(sub, (B, C, N), dtype=jnp.float32)

    for mode in ("default", "advection", "smagorinsky"):
        model = BurgersParamPDE(mode, params)
        out = jax.block_until_ready(model(state))
        ref = _reference_rhs(state, mode, params["nu"], params["DX"], params["Cs"])
        if out.shape != state.shape or not jnp.allclose(out, ref, atol=1e-3, rtol=1e-4):
            ok = False

    # 2) Larger row count exercising the >=4-step, even, pipelined grid path.
    B2, C2, N2 = 32, 64, 256  # B*C = 2048 rows -> TM=512, grid=(4,)
    dx2 = float(L) / N2
    params2 = {"DX": dx2, "nu": 0.01, "DT": 1e-3, "N": N2, "L": float(L), "Cs": 0.2}
    key, sub = jax.random.split(key)
    state2 = jax.random.normal(sub, (B2, C2, N2), dtype=jnp.float32)
    model2 = BurgersParamPDE("default", params2)
    out2 = jax.block_until_ready(model2(state2))
    ref2 = _reference_rhs(state2, "default", params2["nu"], params2["DX"], params2["Cs"])
    if out2.shape != state2.shape or not jnp.allclose(out2, ref2, atol=1e-3, rtol=1e-4):
        ok = False

    # 3) Ragged row count (B*C not a multiple of the tile) -> masked last block.
    B3, C3, N3 = 5, 3, 256  # B*C = 15 rows, TM=8, grid=(2,)
    key, sub = jax.random.split(key)
    state3 = jax.random.normal(sub, (B3, C3, N3), dtype=jnp.float32)
    model3 = BurgersParamPDE("smagorinsky", params2)
    out3 = jax.block_until_ready(model3(state3))
    ref3 = _reference_rhs(state3, "smagorinsky", params2["nu"], params2["DX"], params2["Cs"])
    if out3.shape != state3.shape or not jnp.allclose(out3, ref3, atol=1e-3, rtol=1e-4):
        ok = False

    # 4) 'none' mode returns zeros (documented difference vs. torch scalar 0).
    model_none = BurgersParamPDE("none", params)
    out_none = jax.block_until_ready(model_none(state))
    if not jnp.allclose(out_none, jnp.zeros_like(state)):
        ok = False

    # 5) Fused Euler fast path: u + dt * rhs in one HBM pass.
    model_e = BurgersParamPDE("default", params)
    out_e = jax.block_until_ready(model_e.euler_step(state))
    ref_e = state + params["DT"] * _reference_rhs(
        state, "default", params["nu"], params["DX"], params["Cs"])
    if not jnp.allclose(out_e, ref_e, atol=1e-5, rtol=1e-5):
        ok = False

    print("KERNEL_OK" if ok else "KERNEL_MISMATCH")
</pallas_src>

<mosaic_0001>
module attributes {stable_mosaic.version = 11 : i64} {
  func.func @_burgers_rhs_kernel(%arg0: i32, %arg1: memref<2x256xf32, #tpu.memory_space<vmem>>, %arg2: memref<2x256xf32, #tpu.memory_space<vmem>>) attributes {dimension_semantics = [#tpu.dimension_semantics<parallel>], iteration_bounds = array<i64: 1>, scalar_prefetch = 0 : i64, scratch_operands = 0 : i64, tpu.core_type = #tpu.core_type<tc>, window_params = [{transform_indices = @transform_0, window_bounds = array<i64: 2, 256>}, {transform_indices = @transform_1, window_bounds = array<i64: 2, 256>}]} {
    %c0 = arith.constant 0 : index
    %c0_0 = arith.constant 0 : index
    %0 = vector.load %arg1[%c0, %c0_0] : memref<2x256xf32, #tpu.memory_space<vmem>>, vector<2x256xf32>
    %c255_i32 = arith.constant 255 : i32
    %1 = tpu.dynamic_rotate %0 by %c255_i32 dim 1 : vector<2x256xf32>, i32 -> vector<2x256xf32>
    %c1_i32 = arith.constant 1 : i32
    %2 = tpu.dynamic_rotate %0 by %c1_i32 dim 1 : vector<2x256xf32>, i32 -> vector<2x256xf32>
    %3 = arith.subf %1, %2 : vector<2x256xf32>
    %cst = arith.constant 20.3718319 : f32
    %4 = vector.broadcast %cst : f32 to vector<2x256xf32>
    %5 = arith.mulf %3, %4 : vector<2x256xf32>
    %6 = arith.addf %1, %2 : vector<2x256xf32>
    %7 = arith.addf %0, %0 : vector<2x256xf32>
    %8 = arith.subf %6, %7 : vector<2x256xf32>
    %cst_1 = arith.constant 16.600462 : f32
    %9 = vector.broadcast %cst_1 : f32 to vector<2x256xf32>
    %10 = arith.mulf %9, %8 : vector<2x256xf32>
    %11 = arith.mulf %0, %5 : vector<2x256xf32>
    %12 = arith.subf %10, %11 : vector<2x256xf32>
    %c0_2 = arith.constant 0 : index
    %c0_3 = arith.constant 0 : index
    %13 = vector.load %arg2[%c0_2, %c0_3] : memref<2x256xf32, #tpu.memory_space<vmem>>, vector<2x256xf32>
    tpu.vector_store %arg2[%c0_2, %c0_3], %12 {strides = array<i32>} : memref<2x256xf32, #tpu.memory_space<vmem>>, vector<2x256xf32>,
    return
  }
  func.func @transform_0(%arg0: i32) -> (i32, i32) {
    %c0_i32 = arith.constant 0 : i32
    %c0_i32_0 = arith.constant 0 : i32
    return %arg0, %c0_i32 : i32, i32
  }
  func.func @transform_1(%arg0: i32) -> (i32, i32) {
    %c0_i32 = arith.constant 0 : i32
    %c0_i32_0 = arith.constant 0 : i32
    return %arg0, %c0_i32 : i32, i32
  }
}

</mosaic_0001>

<bundles_post_ra>
// kernel: tpu_custom_call.1
= control target key start
LH: loop header
LB: loop body
LE: loop exit
PB: predicated region body
PF: predicated region fallthrough
CT: control target
= control target key end

     0   :  { %6 = vsyncpa [#allocation3], 0  ;;  %s216_s0 = inlined_call_operand.hbm [shape: f32[2,256], index: 0, kind: input, shape index: {}]   ;;  %s217_s1 = inlined_call_operand.hbm [shape: f32[2,256], index: 1, kind: output, shape index: {}]  }
   0x1   :  { %7 = vsyncpa [#allocation4], 0  ;;  %s177_s6 = smov [#allocation2]   ;;  %s129_s10 = scalar_lea.hbm %s216_s0, 64 }
   0x2   :  { %s14_s7 = sshll.u32 %s177_s6, 4  ;;  %p130_p0 = scmp.ne.s32.totalorder %s216_s0, %s129_s10  ;;  %s15_s7 = int_to_ptr.vmem [resolvable:$true] %s14_s7 }
   0x3   :  { %p133_p1 = scmp.lt.u32.totalorder %s129_s10, %s216_s0 }
   0x5   :  { %p135_p2 = pnand %p133_p1, %p130_p0 }
   0x7   :  { %138 = shalt.err (!%p135_p2)
}
   0x8   :  { %s139_s15 = scalar_lea.vmem %s15_s7, 64  ;;  %p144_p4 = scmp.lt.s32.totalorder %s15_s7, %s15_s7 }
   0x9   :  { %p140_p3 = scmp.ne.s32.totalorder %s15_s7, %s139_s15  ;;  %p145_p5 = scmp.lt.s32.totalorder %s139_s15, %s139_s15 }
   0xb   :  { %p146_p6 = por %p145_p5, %p144_p4 }
   0xd   :  { %p147_p7 = pnand %p146_p6, %p140_p3 }
   0xf   :  { %150 = shalt.err (!%p147_p7)
}
  0x10   :  { %17 = dma.hbm_to_vmem [thread:$0]  %s216_s0, 64, %s15_s7, [#allocation3]  }
  0x11   :  { %173 = dma.done.wait [#allocation3], 64  }
  0x12   :  { %174 = vsyncadd [#allocation3], 4294967232  ;;  %v26_v0 = vlaneseq  ;;  %v178_v1 = vmov 1983009808   ;;  %v21_v6 = vld [vmem:[#allocation2] sm:$0xf] }
  0x13   :  { %v24_v2 = vunpack.c.l.s4 %v178_v1  ;;  %s179_s18 = smov 1   ;;  %s180_s19 = smov 127   ;;  %v55_v12 = vadd.f32 %v21_v6, %v21_v6 }
  0x14   :  { %v27_v3 = vshrl.u32 %v26_v0, 7  ;;  %v38_v9 = vand.u32 127, %v26_v0  ;;  %s181_s0 = smov [#allocation5]  }
  0x15   :  { %v25_v4 = vunpack.c.0.s8 %v24_v2  ;;  %s114_s20 = sshll.u32 %s181_s0, 4  ;;  %s115_s20 = int_to_ptr.vmem [resolvable:$true] %s114_s20 }
  0x16   :  { %vm46_vm0 = vcmp.lt.s32.totalorder %v38_v9, 1  ;;  %vm39_vm1 = vcmp.lt.s32.totalorder %v38_v9, 127  ;;  %s151_s21 = scalar_lea.vmem %s115_s20, 64  ;;  %p156_p9 = scmp.lt.s32.totalorder %s115_s20, %s115_s20 }
  0x17   :  { %v28_v5 = vsub.s32 %v25_v4, %v27_v3  ;;  %p152_p8 = scmp.ne.s32.totalorder %s115_s20, %s151_s21  ;;  %p157_p10 = scmp.lt.s32.totalorder %s151_s21, %s151_s21 }
  0x19   :  { %v29_v7 = vrot.slane %v21_v6, %v28_v5  ;;  %v63_v19 = vrot.slane %v55_v12, %v28_v5  ;;  %p158_p11 = por %p157_p10, %p156_p9 }
  0x1b   :  { %42 = vrot.lane.b32.xlu1 %v29_v7, %s179_s18  ;;  %33 = vrot.lane.b32.xlu0 %v29_v7, %s180_s19  ;;  %v30_v8 = vcombine.high %v29_v7, %v29_v7  ;;  %v64_v24 = vcombine.high %v63_v19, %v63_v19  ;;  %p159_p12 = pnand %p158_p11, %p152_p8 }
  0x1f   :  { %44 = vrot.lane.b32.xlu1 %v30_v8, %s179_s18  ;;  %35 = vrot.lane.b32.xlu0 %v30_v8, %s180_s19 }
  0x8d   :  { %v43_v10 = vpop.permute.xlu1 %42  ;;  %v34_v11 = vpop.permute.xlu0 %33 }
  0x91   :  { %v45_v13 = vpop.permute.xlu1 %44  ;;  %v36_v14 = vpop.permute.xlu0 %35 }
  0x92   :  { %v47_v15 = vsel %vm46_vm0, %v43_v10, %v45_v13  ;;  %v48_v16 = vsel %vm46_vm0, %v45_v13, %v43_v10  ;;  %v40_v17 = vsel %vm39_vm1, %v34_v11, %v36_v14  ;;  %v41_v18 = vsel %vm39_vm1, %v36_v14, %v34_v11 }
  0x93   :  { %v49_v20 = vsub.f32 %v40_v17, %v48_v16  ;;  %v50_v21 = vsub.f32 %v41_v18, %v47_v15  ;;  %v53_v25 = vadd.f32 %v48_v16, %v40_v17  ;;  %v54_v26 = vadd.f32 %v47_v15, %v41_v18 }
  0x95   :  { %v51_v22 = vmul.f32 20.371832, %v49_v20  ;;  %v52_v23 = vmul.f32 20.371832, %v50_v21  ;;  %v67_v29 = vsub.f32 %v53_v25, %v63_v19  ;;  %v68_v30 = vsub.f32 %v54_v26, %v64_v24 }
  0x97   :  { %v73_v27 = vcombine.low %v51_v22, %v52_v23  ;;  %v69_v33 = vmul.f32 16.600462, %v67_v29  ;;  %v70_v34 = vmul.f32 16.600462, %v68_v30 }
  0x99   :  { %v80_v28 = vrot.slane %v73_v27, %v28_v5 }
  0x9b   :  { %v82_v31 = vmul.f32 %v80_v28, %v21_v6 }
  0x9d   :  { %v90_v32 = vrot.slane %v82_v31, %v28_v5 }
  0x9f   :  { %v91_v35 = vcombine.high %v90_v32, %v90_v32  ;;  %v94_v36 = vsub.f32 %v69_v33, %v90_v32 }
  0xa1   :  { %v95_v37 = vsub.f32 %v70_v34, %v91_v35 }
  0xa3   :  { %v98_v38 = vcombine.low %v94_v36, %v95_v37 }
  0xa5   :  { %123 = vst.sshfl [vmem:[#allocation5] sm:$0x33 pattern:$0x76325410] %v98_v38 }
  0xa6   :  { %162 = shalt.err (!%p159_p12)
}
  0xa7   :  { %s163_s24 = scalar_lea.hbm %s217_s1, 64 }
  0xa8   :  { %p164_p13 = scmp.ne.s32.totalorder %s217_s1, %s163_s24  ;;  %p167_p0 = scmp.lt.u32.totalorder %s163_s24, %s217_s1 }
  0xaa   :  { %p169_p1 = pnand %p167_p0, %p164_p13 }
  0xac   :  { %172 = shalt.err (!%p169_p1)
}
  0xad   :  { %117 = dma.vmem_to_hbm [thread:$0]  %s115_s20, 64, %s217_s1, [#allocation4]  }
  0xae   :  { %175 = dma.done.wait [#allocation4], 64  }
  0xaf   :  { %176 = vsyncadd [#allocation4], 4294967232 }
  0xb0   :  { %121 = vsyncpa [#allocation3], 1 }
  0xb1   :  { %122 = vsyncpa [#allocation4], 1 }

</bundles_post_ra>
